<compile_context>
chip_gen: v7x
topology: tpu7x:2x2x1
jax: 0.10.0
libtpu: 0.0.40
codegen_flags: <defaults>
</compile_context>

<pallas_src>
import functools

import jax
import jax.numpy as jnp
from jax.experimental import pallas as pl
from jax.experimental.pallas import tpu as pltpu


NCLS = 10       # fc2 output classes (fixed by the module: nn.Linear(..., 10))
NPAD = 128      # class dim padded to a full lane width for lane-dense stores
NEG_INF = -1e30


# ----------------------------------------------------------------------------
# Fused Pallas kernel: (conv1 ∘ identity-encoder ∘ fc2) as one affine map
#                      + log_softmax
# ----------------------------------------------------------------------------
def fused_affine_logsoftmax_kernel(x_ref, w_ref, b_ref, o_ref):
    """One batch block per program.

    x_ref : (Bblk, H*W)   flattened input images (lane-dense rows)
    w_ref : (H*W, 128)    collapsed conv1+fc2 weight (classes padded w/ zeros)
    b_ref : (1, 128)      collapsed bias; pad lanes preloaded with -1e30
    o_ref : (Bblk, 128)   log_softmax output (first NCLS lanes valid)
    """
    logits = jnp.dot(x_ref[...], w_ref[...],
                     preferred_element_type=jnp.float32)     # single MXU matmul
    logits = logits + b_ref[...]                             # pad lanes -> -1e30

    # log_softmax: pad lanes contribute exp(-1e30 - m) == 0, no explicit mask.
    m = jnp.max(logits, axis=-1, keepdims=True)
    z = logits - m
    lse = jnp.log(jnp.sum(jnp.exp(z), axis=-1, keepdims=True))
    o_ref[...] = (z - lse).astype(o_ref.dtype)


# ----------------------------------------------------------------------------
# Forward pass wrapper
# ----------------------------------------------------------------------------
def net_forward(x, kparams, *, block_b=256):
    """x: (B, 1, H, W) float32 (NCHW, like the PyTorch module)."""
    B, cin, H, W = x.shape
    assert cin == 1
    HW = H * W
    w_eff = kparams["w_eff"]                  # (H*W, 128)
    b_eff = kparams["b_eff"]                  # (1, 128)
    assert w_eff.shape == (HW, NPAD)

    x_flat = x.reshape(B, HW)                 # free (contiguous) reshape

    # Batch block: multiple of 8 sublanes, capped at block_b (MXU row count).
    bblk = min(block_b, ((B + 7) // 8) * 8)
    bblk = max(8, ((bblk + 7) // 8) * 8)
    b_pad = pl.cdiv(B, bblk) * bblk
    if b_pad != B:
        x_flat = jnp.pad(x_flat, ((0, b_pad - B), (0, 0)))

    out_pad = pl.pallas_call(
        fused_affine_logsoftmax_kernel,
        out_shape=jax.ShapeDtypeStruct((b_pad, NPAD), jnp.float32),
        grid=(b_pad // bblk,),
        in_specs=[
            pl.BlockSpec((bblk, HW), lambda b: (b, 0)),     # per-step x block
            pl.BlockSpec((HW, NPAD), lambda b: (0, 0)),     # resident weight
            pl.BlockSpec((1, NPAD), lambda b: (0, 0)),      # resident bias
        ],
        out_specs=pl.BlockSpec((bblk, NPAD), lambda b: (b, 0)),
        compiler_params=pltpu.CompilerParams(
            dimension_semantics=("parallel",)),
    )(x_flat, w_eff, b_eff)

    return out_pad[:B, :NCLS]                 # drop batch + lane padding


# ----------------------------------------------------------------------------
# Parameter init (PyTorch layouts) + one-time kernel layout preparation
# ----------------------------------------------------------------------------
def init_params(key, *, conv_out_channels, hw):
    Ho = Wo = hw - 2
    D = conv_out_channels * Ho * Wo           # flattened dim feeding fc2
    k0, k1, k2, k3 = jax.random.split(key, 4)
    return {
        "conv1_w": 0.1 * jax.random.normal(k0, (conv_out_channels, 1, 3, 3), jnp.float32),
        "conv1_b": 0.1 * jax.random.normal(k1, (conv_out_channels,), jnp.float32),
        "fc2_w": 0.05 * jax.random.normal(k2, (NCLS, D), jnp.float32),
        "fc2_b": 0.05 * jax.random.normal(k3, (NCLS,), jnp.float32),
    }


def prepare_kernel_params(params, *, H, W, n_pad=NPAD):
    """Collapse conv1 + identity encoder + fc2 into one affine map (ONCE).

    logits[b, n] = sum_q x[b, q] * W_eff[q, n] + b_eff[n]
      W_eff[(i+di)*W + (j+dj), n] = sum_c conv_w[c, di, dj] * fc_w[n, (i*Wo+j)*C + c]
      b_eff[n]                    = fc2_b[n] + sum_{c,i,j} conv_b[c] * fc_w[n, (i*Wo+j)*C + c]
    Valid only while the encoder is identity and there is no activation
    between conv1 and fc2.
    """
    conv_w = params["conv1_w"]                 # (C, 1, 3, 3)
    conv_b = params["conv1_b"]                 # (C,)
    fc_w = params["fc2_w"]                     # (NCLS, D), D = Ho*Wo*C
    fc_b = params["fc2_b"]                     # (NCLS,)

    C = conv_w.shape[0]
    Ho, Wo = H - 2, W - 2
    assert fc_w.shape == (NCLS, Ho * Wo * C)

    # PyTorch flatten of (B, Ho*Wo, C): flat index d = (i*Wo + j)*C + c
    fw4 = jnp.transpose(fc_w.reshape(NCLS, Ho, Wo, C), (3, 1, 2, 0))  # (C, Ho, Wo, NCLS)

    w_eff = jnp.zeros((H, W, NCLS), jnp.float32)
    for di in range(3):
        for dj in range(3):
            tap = jnp.einsum("c,cijn->ijn", conv_w[:, 0, di, dj], fw4)  # (Ho, Wo, NCLS)
            w_eff = w_eff.at[di:di + Ho, dj:dj + Wo, :].add(tap)
    w_eff = w_eff.reshape(H * W, NCLS)
    w_eff = jnp.pad(w_eff, ((0, 0), (0, n_pad - NCLS)))               # zero pad classes

    b_eff = fc_b + jnp.einsum("c,cijn->n", conv_b, fw4)               # (NCLS,)
    b_eff = jnp.concatenate(
        [b_eff, jnp.full((n_pad - NCLS,), NEG_INF, jnp.float32)]).reshape(1, n_pad)

    return {"w_eff": w_eff, "b_eff": b_eff}


# ----------------------------------------------------------------------------
# Pure-JAX reference (same semantics, identity encoder) for verification
# ----------------------------------------------------------------------------
def reference_forward(x, params):
    y = jax.lax.conv_general_dilated(
        x, params["conv1_w"], window_strides=(1, 1), padding="VALID",
        dimension_numbers=("NCHW", "OIHW", "NCHW"))
    y = y + params["conv1_b"][None, :, None, None]
    B, C, Ho, Wo = y.shape
    y = y.reshape(B, C, Ho * Wo).transpose(0, 2, 1)            # (B, P, C)
    flat = y.reshape(B, -1)
    logits = flat @ params["fc2_w"].T + params["fc2_b"]
    return jax.nn.log_softmax(logits, axis=-1)


if __name__ == "__main__":
    key = jax.random.PRNGKey(0)
    kx, kp = jax.random.split(key)

    # Small shapes consistent with the module: single-channel image,
    # conv1 channels scaled 80 -> 8, fc2 input scaled accordingly.
    B, H, W = 2, 16, 16
    C_OUT = 8

    x = jax.random.normal(kx, (B, 1, H, W), jnp.float32)       # NCHW like PyTorch
    params = init_params(kp, conv_out_channels=C_OUT, hw=H)
    kparams = prepare_kernel_params(params, H=H, W=W)          # one-time collapse

    fwd = jax.jit(functools.partial(net_forward, kparams=kparams))
    out = jax.block_until_ready(fwd(x))

    assert out.shape == (B, NCLS)
    # log_softmax rows should exponentiate-sum to 1
    assert jnp.allclose(jnp.sum(jnp.exp(out), axis=-1), 1.0, atol=1e-4)
    # match the pure-JAX reference of the same (encoder-less) forward
    ref = reference_forward(x, params)
    assert jnp.allclose(out, ref, atol=1e-3, rtol=1e-3)

    print("KERNEL_OK")
</pallas_src>

<mosaic_0001>
module attributes {stable_mosaic.version = 11 : i64} {
  func.func @fused_affine_logsoftmax_kernel(%arg0: i32, %arg1: memref<8x256xf32, #tpu.memory_space<vmem>>, %arg2: memref<256x128xf32, #tpu.memory_space<vmem>>, %arg3: memref<1x128xf32, #tpu.memory_space<vmem>>, %arg4: memref<8x128xf32, #tpu.memory_space<vmem>>) attributes {dimension_semantics = [#tpu.dimension_semantics<parallel>], iteration_bounds = array<i64: 1>, scalar_prefetch = 0 : i64, scratch_operands = 0 : i64, tpu.core_type = #tpu.core_type<tc>, window_params = [{transform_indices = @transform_0, window_bounds = array<i64: 8, 256>}, {pipeline_mode = #tpu.pipeline_mode<synchronous>, transform_indices = @transform_1, window_bounds = array<i64: 256, 128>}, {pipeline_mode = #tpu.pipeline_mode<synchronous>, transform_indices = @transform_2, window_bounds = array<i64: 1, 128>}, {transform_indices = @transform_3, window_bounds = array<i64: 8, 128>}]} {
    %c0 = arith.constant 0 : index
    %c0_0 = arith.constant 0 : index
    %0 = vector.load %arg1[%c0, %c0_0] : memref<8x256xf32, #tpu.memory_space<vmem>>, vector<8x256xf32>
    %c0_1 = arith.constant 0 : index
    %c0_2 = arith.constant 0 : index
    %1 = vector.load %arg2[%c0_1, %c0_2] : memref<256x128xf32, #tpu.memory_space<vmem>>, vector<256x128xf32>
    %cst = arith.constant dense<0.000000e+00> : vector<8x128xf32>
    %2 = tpu.matmul %0, %1, %cst {dimension_numbers = #tpu.dot_dimension_numbers<[1], [0], [0], [1], [0, 0, 1, 1], [], []>} : vector<8x256xf32>, vector<256x128xf32>, vector<8x128xf32> -> vector<8x128xf32>
    %c0_3 = arith.constant 0 : index
    %c0_4 = arith.constant 0 : index
    %3 = vector.load %arg3[%c0_3, %c0_4] : memref<1x128xf32, #tpu.memory_space<vmem>>, vector<1x128xf32>
    %4 = vector.broadcast %3 : vector<1x128xf32> to vector<8x128xf32>
    %5 = arith.addf %2, %4 : vector<8x128xf32>
    %cst_5 = arith.constant dense<0xFF800000> : vector<8xf32>
    %6 = vector.multi_reduction <maximumf>, %5, %cst_5 [1] : vector<8x128xf32> to vector<8xf32>
    %7 = vector.shape_cast %6 : vector<8xf32> to vector<8x1xf32>
    %8 = vector.broadcast %7 : vector<8x1xf32> to vector<8x128xf32>
    %9 = arith.subf %5, %8 : vector<8x128xf32>
    %10 = math.exp %9 : vector<8x128xf32>
    %cst_6 = arith.constant dense<0.000000e+00> : vector<8xf32>
    %11 = vector.multi_reduction <add>, %10, %cst_6 [1] : vector<8x128xf32> to vector<8xf32>
    %12 = vector.shape_cast %11 : vector<8xf32> to vector<8x1xf32>
    %13 = math.log %12 : vector<8x1xf32>
    %14 = vector.broadcast %13 : vector<8x1xf32> to vector<8x128xf32>
    %15 = arith.subf %9, %14 : vector<8x128xf32>
    %c0_7 = arith.constant 0 : index
    %c0_8 = arith.constant 0 : index
    %16 = vector.load %arg4[%c0_7, %c0_8] : memref<8x128xf32, #tpu.memory_space<vmem>>, vector<8x128xf32>
    tpu.vector_store %arg4[%c0_7, %c0_8], %15 {strides = array<i32>} : memref<8x128xf32, #tpu.memory_space<vmem>>, vector<8x128xf32>,
    return
  }
  func.func @transform_0(%arg0: i32) -> (i32, i32) {
    %c0_i32 = arith.constant 0 : i32
    %c0_i32_0 = arith.constant 0 : i32
    return %arg0, %c0_i32 : i32, i32
  }
  func.func @transform_1(%arg0: i32) -> (i32, i32) {
    %c0_i32 = arith.constant 0 : i32
    %c0_i32_0 = arith.constant 0 : i32
    %c0_i32_1 = arith.constant 0 : i32
    return %c0_i32, %c0_i32_0 : i32, i32
  }
  func.func @transform_2(%arg0: i32) -> (i32, i32) {
    %c0_i32 = arith.constant 0 : i32
    %c0_i32_0 = arith.constant 0 : i32
    %c0_i32_1 = arith.constant 0 : i32
    return %c0_i32, %c0_i32_0 : i32, i32
  }
  func.func @transform_3(%arg0: i32) -> (i32, i32) {
    %c0_i32 = arith.constant 0 : i32
    %c0_i32_0 = arith.constant 0 : i32
    return %arg0, %c0_i32 : i32, i32
  }
}

</mosaic_0001>

<bundles_post_ra>
// kernel: net_forward.1
= control target key start
LH: loop header
LB: loop body
LE: loop exit
PB: predicated region body
PF: predicated region fallthrough
CT: control target
= control target key end

     0   :  { %8 = vsyncpa [#allocation3], 0  ;;  %s254_s12 = smov [#allocation2]   ;;  %s301_s0 = inlined_call_operand.vmem [shape: f32[8,256], index: 0, kind: input, shape index: {}]   ;;  %s302_s1 = inlined_call_operand.hbm [shape: f32[256,128], index: 1, kind: input, shape index: {}]   ;;  %s303_s2 = inlined_call_operand.vmem [shape: f32[1,128], index: 2, kind: input, shape index: {}]   ;;  %s304_s3 = inlined_call_operand.vmem [shape: f32[8,128], index: 3, kind: output, shape index: {}]  }
   0x1   :  { %s16_s13 = sshll.u32 %s254_s12, 4  ;;  %s230_s16 = scalar_lea.hbm %s302_s1, 4096  ;;  %s17_s13 = int_to_ptr.vmem [resolvable:$true] %s16_s13 }
   0x2   :  { %p231_p0 = scmp.ne.s32.totalorder %s302_s1, %s230_s16  ;;  %p234_p1 = scmp.lt.u32.totalorder %s230_s16, %s302_s1 }
   0x4   :  { %p236_p2 = pnand %p234_p1, %p231_p0 }
   0x6   :  { %239 = shalt.err (!%p236_p2)
}
   0x7   :  { %s240_s21 = scalar_lea.vmem %s17_s13, 4096  ;;  %p245_p4 = scmp.lt.s32.totalorder %s17_s13, %s17_s13 }
   0x8   :  { %p241_p3 = scmp.ne.s32.totalorder %s17_s13, %s240_s21  ;;  %p246_p5 = scmp.lt.s32.totalorder %s240_s21, %s240_s21 }
   0xa   :  { %p247_p6 = por %p246_p5, %p245_p4 }
   0xc   :  { %p248_p7 = pnand %p247_p6, %p241_p3 }
   0xe   :  { %251 = shalt.err (!%p248_p7)
}
   0xf   :  { %s255_s22 = smov 128   ;;  %s256_s23 = smov 8  }
  0x10   :  { %22 = dma.hbm_to_vmem [thread:$0]  %s302_s1, 4096, %s17_s13, [#allocation3], %s255_s22, %s255_s22, %s256_s23  }
  0x11   :  { %252 = dma.done.wait [#allocation3], 4096  }
  0x12   :  { %253 = vsyncadd [#allocation3], 4294963200  ;;  %v46_v0 = vld [vmem:[#allocation2 + $0x80] sm:$0xff]  ;;  %v47_v1 = vld [vmem:[#allocation2 + $0x88] sm:$0xff] }
  0x13   :  { %v30_v2 = vld [vmem:[#allocation2] sm:$0xff]  ;;  %v191_v3 = vpack.c.bf16 %v47_v1, %v46_v0  ;;  %v31_v4 = vld [vmem:[#allocation2 + $0x8] sm:$0xff]  ;;  %v48_v5 = vld [vmem:[#allocation2 + $0x90] sm:$0xff] }
  0x14   :  { %v49_v6 = vld [vmem:[#allocation2 + $0x98] sm:$0xff]  ;;  %v193_v7 = vpack.c.bf16 %v31_v4, %v30_v2  ;;  %v32_v9 = vld [vmem:[#allocation2 + $0x10] sm:$0xff]  ;;  %v50_v11 = vld [vmem:[#allocation2 + $0xa0] sm:$0xff] }
  0x15   :  { %v195_v8 = vpack.c.bf16 %v49_v6, %v48_v5  ;;  %v33_v10 = vld [vmem:[#allocation2 + $0x18] sm:$0xff]  ;;  %192 = vmatprep.subr.bf16.mxu0 %v191_v3  ;;  %v51_v12 = vld [vmem:[#allocation2 + $0xa8] sm:$0xff]  ;;  %v34_v15 = vld [vmem:[#allocation2 + $0x20] sm:$0xff] }
  0x16   :  { %194 = vmatpush3.bf16.msra.mxu0 %v193_v7  ;;  %v197_v13 = vpack.c.bf16 %v33_v10, %v32_v9  ;;  %v199_v14 = vpack.c.bf16 %v51_v12, %v50_v11  ;;  %v35_v16 = vld [vmem:[#allocation2 + $0x28] sm:$0xff]  ;;  %v52_v17 = vld [vmem:[#allocation2 + $0xb0] sm:$0xff]  ;;  %v53_v18 = vld [vmem:[#allocation2 + $0xb8] sm:$0xff] }
  0x17   :  { %196 = vmatprep.subr.bf16.mxu0 %v195_v8  ;;  %v201_v19 = vpack.c.bf16 %v35_v16, %v34_v15  ;;  %v203_v20 = vpack.c.bf16 %v53_v18, %v52_v17  ;;  %v36_v21 = vld [vmem:[#allocation2 + $0x30] sm:$0xff]  ;;  %v37_v22 = vld [vmem:[#allocation2 + $0x38] sm:$0xff]  ;;  %v54_v23 = vld [vmem:[#allocation2 + $0xc0] sm:$0xff] }
  0x18   :  { %v55_v24 = vld [vmem:[#allocation2 + $0xc8] sm:$0xff]  ;;  %v205_v26 = vpack.c.bf16 %v37_v22, %v36_v21  ;;  %v38_v28 = vld [vmem:[#allocation2 + $0x40] sm:$0xff]  ;;  %v56_v30 = vld [vmem:[#allocation2 + $0xd0] sm:$0xff] }
  0x19   :  { %v29_v25 = vld [vmem:[%s301_s0 + $0x8] sm:$0xff]  ;;  %v207_v27 = vpack.c.bf16 %v55_v24, %v54_v23  ;;  %v57_v31 = vld [vmem:[#allocation2 + $0xd8] sm:$0xff]  ;;  %v40_v34 = vld [vmem:[#allocation2 + $0x50] sm:$0xff] }
  0x1a   :  { %198 = vmatpush3.bf16.msra.mxu0 %v197_v13  ;;  %133 = vmatprep.mubr.f32.mxu0 %v29_v25  ;;  %v39_v29 = vld [vmem:[#allocation2 + $0x48] sm:$0xff]  ;;  %v211_v33 = vpack.c.bf16 %v57_v31, %v56_v30  ;;  %v41_v35 = vld [vmem:[#allocation2 + $0x58] sm:$0xff]  ;;  %v58_v36 = vld [vmem:[#allocation2 + $0xe0] sm:$0xff] }
  0x1b   :  { %200 = vmatprep.subr.bf16.mxu0 %v199_v14  ;;  %v209_v32 = vpack.c.bf16 %v39_v29, %v38_v28  ;;  %v59_v37 = vld [vmem:[#allocation2 + $0xe8] sm:$0xff]  ;;  %v213_v38 = vpack.c.bf16 %v41_v35, %v40_v34  ;;  %v42_v40 = vld [vmem:[#allocation2 + $0x60] sm:$0xff]  ;;  %v60_v42 = vld [vmem:[#allocation2 + $0xf0] sm:$0xff] }
  0x1c   :  { %v215_v39 = vpack.c.bf16 %v59_v37, %v58_v36  ;;  %v43_v41 = vld [vmem:[#allocation2 + $0x68] sm:$0xff]  ;;  %v61_v43 = vld [vmem:[#allocation2 + $0xf8] sm:$0xff]  ;;  %v44_v46 = vld [vmem:[#allocation2 + $0x70] sm:$0xff] }
  0x1d   :  { %v217_v44 = vpack.c.bf16 %v43_v41, %v42_v40  ;;  %v219_v45 = vpack.c.bf16 %v61_v43, %v60_v42  ;;  %v45_v47 = vld [vmem:[#allocation2 + $0x78] sm:$0xff]  ;;  %v28_v49 = vld [vmem:[%s301_s0] sm:$0xff] }
  0x1e   :  { %202 = vmatpush3.bf16.msra.mxu0 %v201_v19  ;;  %v221_v48 = vpack.c.bf16 %v45_v47, %v44_v46  ;;  %v155_v52 = vld [vmem:[%s303_s2] ss:$0 sm:$0xff] }
  0x1f   :  { %204 = vmatprep.subr.bf16.mxu0 %v203_v20 }
  0x22   :  { %206 = vmatpush3.bf16.msra.mxu0 %v205_v26 }
  0x23   :  { %208 = vmatprep.subr.bf16.mxu0 %v207_v27 }
  0x26   :  { %210 = vmatpush3.bf16.msra.mxu0 %v209_v32 }
  0x27   :  { %212 = vmatprep.subr.bf16.mxu0 %v211_v33 }
  0x2a   :  { %214 = vmatpush3.bf16.msra.mxu0 %v213_v38 }
  0x2b   :  { %216 = vmatprep.subr.bf16.mxu0 %v215_v39 }
  0x2e   :  { %218 = vmatpush3.bf16.msra.mxu0 %v217_v44 }
  0x2f   :  { %220 = vmatprep.subr.bf16.mxu0 %v219_v45 }
  0x32   :  { %222 = vmatpush3.bf16.msra.mxu0 %v221_v48 }
  0x35   :  { %134 = vmatmul.mubr.f32.vlgmr.msra.gmra.mrb[0].mxu0 %v28_v49 }
 0x108   :  { %v188_v50 = vpop.f32.mrb[0].mxu0 }
 0x109   :  { %v189_v51 = vpop.f32.mrb[1].mxu0 }
 0x10a   :  { %v190_v53 = vadd.f32 %v189_v51, %v188_v50 }
 0x10c   :  { %v136_v54 = vadd.f32 %v190_v53, %v155_v52 }
 0x10e   :  { %139 = vmax.xlane.f32.xlu0 %v136_v54 }
 0x19b   :  { %v140_v55 = vpop.xlane.xlu0 %139 }
 0x19c   :  { %v141_v56 = vsub.f32 %v136_v54, %v140_v55 }
 0x19e   :  { %v142_v57 = vmul.f32 1.442695, %v141_v56 }
 0x1a0   :  { %226 = vpow2.f32 %v142_v57 }
 0x1aa   :  { %v227_v58 = vpop.eup %226 }
 0x1ab   :  { %144 = vadd.xlane.f32.xlu0 %v227_v58 }
 0x238   :  { %v145_v59 = vpop.xlane.xlu0 %144 }
 0x239   :  { %228 = vlog2.f32 %v145_v59 }
 0x243   :  { %v229_v60 = vpop.eup %228 }
 0x244   :  { %v147_v61 = vmul.f32 0.6931472, %v229_v60 }
 0x246   :  { %v148_v62 = vsub.f32 %v141_v56, %v147_v61 }
 0x248   :  { %149 = vst [vmem:[%s304_s3] sm:$0xff] %v148_v62 }
 0x249   :  { %154 = vsyncpa [#allocation3], 1 }

</bundles_post_ra>
